<compile_context>
chip_gen: v6e
topology: v6e:2x2x1
jax: 0.10.0
libtpu: 0.0.40
codegen_flags: <defaults>
</compile_context>

<pallas_src>
import math
import functools

import jax
import jax.numpy as jnp
from jax.experimental import pallas as pl
from jax.experimental.pallas import tpu as pltpu

# ----------------------------- configuration ------------------------------
HIDDEN_SIZE = 32
NUM_HEADS = 4
HEAD_DIM = HIDDEN_SIZE // NUM_HEADS
SEQ_LEN = 8
BATCH = 2
DROPOUT_PROB = 0.1  # TODO(synk): dropout is identity at inference; not applied in-kernel.
# TODO(synk): optional attention_mask / head_mask inputs are not supported (None path only).


def _self_attention_kernel(x_ref, wqkv_ref, bqkv_ref, out_ref,
                           *, num_heads: int, head_dim: int):
    """Whole problem in one invocation.

    x_ref    : [B, S, H]   hidden states (VMEM)
    wqkv_ref : [H, 3H]     fused, pre-transposed Q|K|V weights (x @ W)
    bqkv_ref : [1, 3H]     fused Q|K|V biases
    out_ref  : [B, S, H]   context layer
    """
    B, S, H = x_ref.shape

    # Fused QKV projection: one MXU matmul for all of Q, K, V over all tokens.
    x2 = x_ref[...].reshape(B * S, H)
    qkv = jnp.dot(x2, wqkv_ref[...],
                  preferred_element_type=jnp.float32) + bqkv_ref[...]
    qkv = qkv.reshape(B, S, 3 * H)

    scale = 1.0 / math.sqrt(head_dim)

    # Per-head attention, batched over B; heads are static so this unrolls at
    # trace time.
    # TODO(synk): at real BERT shapes, pad/pack heads so the lane dim is a
    # multiple of 128 instead of slicing 8-lane head columns.
    ctxs = []
    for h in range(num_heads):
        lo = h * head_dim
        qh = qkv[:, :, lo:lo + head_dim]                    # [B, S, d]
        kh = qkv[:, :, H + lo:H + lo + head_dim]            # [B, S, d]
        vh = qkv[:, :, 2 * H + lo:2 * H + lo + head_dim]    # [B, S, d]

        # attention_scores = (Q K^T) / sqrt(d), batched over B.
        scores = jnp.einsum("bqd,bkd->bqk", qh, kh,
                            preferred_element_type=jnp.float32) * scale

        # numerically stabilized softmax over the last dim
        scores = scores - jnp.max(scores, axis=-1, keepdims=True)
        probs = jnp.exp(scores)
        probs = probs * pl.reciprocal(
            jnp.sum(probs, axis=-1, keepdims=True), approx=True)

        # context = probs @ V
        ctxs.append(jnp.einsum("bqk,bkd->bqd", probs, vh,
                               preferred_element_type=jnp.float32))

    # Head re-concatenation -> single full-width (lane-dense) store.
    ctx = jnp.concatenate(ctxs, axis=-1)                    # [B, S, H]
    out_ref[...] = ctx.astype(out_ref.dtype)


def prepare_qkv_params(wq, wk, wv, bq, bk, bv):
    """One-time prep: transpose torch-style [H_out, H_in] weights and fuse QKV.

    Returns (wqkv [H, 3H], bqkv [1, 3H]); do this once, not per forward call.
    """
    wqkv = jnp.concatenate(
        [jnp.asarray(w, jnp.float32).T for w in (wq, wk, wv)], axis=1)
    bqkv = jnp.concatenate(
        [jnp.asarray(b, jnp.float32) for b in (bq, bk, bv)]).reshape(1, -1)
    return wqkv, bqkv


def self_attention_pallas(hidden_states, wqkv, bqkv, *, num_heads: int):
    """hidden_states: [B, S, H]; wqkv: [H, 3H] (pre-transposed, fused); bqkv: [1, 3H]."""
    B, S, H = hidden_states.shape
    head_dim = H // num_heads

    kernel = functools.partial(_self_attention_kernel,
                               num_heads=num_heads, head_dim=head_dim)

    # Everything fits trivially in VMEM -> no grid, whole arrays as one block.
    vmem_spec = lambda: pl.BlockSpec(memory_space=pltpu.MemorySpace.VMEM)

    return pl.pallas_call(
        kernel,
        out_shape=jax.ShapeDtypeStruct((B, S, H), jnp.float32),
        in_specs=[vmem_spec(), vmem_spec(), vmem_spec()],
        out_specs=vmem_spec(),
    )(hidden_states.astype(jnp.float32), wqkv, bqkv)


def self_attention_reference(hidden_states, wq, wk, wv, bq, bk, bv,
                             *, num_heads: int):
    """Pure-JAX reference mirroring the PyTorch forward (eval mode)."""
    B, S, H = hidden_states.shape
    d = H // num_heads

    def proj(w, b):
        return hidden_states @ w.T + b

    def split_heads(x):  # [B, S, H] -> [B, nH, S, d]
        return x.reshape(B, S, num_heads, d).transpose(0, 2, 1, 3)

    q = split_heads(proj(wq, bq))
    k = split_heads(proj(wk, bk))
    v = split_heads(proj(wv, bv))
    scores = jnp.einsum("bhqd,bhkd->bhqk", q, k) / math.sqrt(d)
    probs = jax.nn.softmax(scores, axis=-1)
    ctx = jnp.einsum("bhqk,bhkd->bhqd", probs, v)
    return ctx.transpose(0, 2, 1, 3).reshape(B, S, H)


if __name__ == "__main__":
    key = jax.random.PRNGKey(0)
    kx, kwq, kwk, kwv, kbq, kbk, kbv = jax.random.split(key, 7)

    H = HIDDEN_SIZE
    bound = 1.0 / math.sqrt(H)
    wq = jax.random.uniform(kwq, (H, H), jnp.float32, -bound, bound)
    wk = jax.random.uniform(kwk, (H, H), jnp.float32, -bound, bound)
    wv = jax.random.uniform(kwv, (H, H), jnp.float32, -bound, bound)
    bq = jax.random.uniform(kbq, (H,), jnp.float32, -bound, bound)
    bk = jax.random.uniform(kbk, (H,), jnp.float32, -bound, bound)
    bv = jax.random.uniform(kbv, (H,), jnp.float32, -bound, bound)

    hidden_states = jax.random.normal(kx, (BATCH, SEQ_LEN, H), jnp.float32)

    # One-time parameter preprocessing (hoisted out of the per-call path).
    wqkv, bqkv = prepare_qkv_params(wq, wk, wv, bq, bk, bv)
    wqkv = jax.block_until_ready(wqkv)
    bqkv = jax.block_until_ready(bqkv)

    out = self_attention_pallas(hidden_states, wqkv, bqkv, num_heads=NUM_HEADS)
    out = jax.block_until_ready(out)

    ref = self_attention_reference(hidden_states, wq, wk, wv, bq, bk, bv,
                                   num_heads=NUM_HEADS)
    assert out.shape == (BATCH, SEQ_LEN, H)
    # tolerance loosened slightly for pl.reciprocal(approx=True) in the softmax
    assert jnp.allclose(out, ref, atol=2e-3, rtol=2e-3), \
        f"max abs diff {jnp.max(jnp.abs(out - ref))}"

    print("KERNEL_OK")
</pallas_src>

<mosaic_0001>
module attributes {stable_mosaic.version = 11 : i64} {
  func.func @_self_attention_kernel(%arg0: memref<2x8x32xf32, #tpu.memory_space<vmem>>, %arg1: memref<32x96xf32, #tpu.memory_space<vmem>>, %arg2: memref<1x96xf32, #tpu.memory_space<vmem>>, %arg3: memref<2x8x32xf32, #tpu.memory_space<vmem>>) attributes {dimension_semantics = [], scalar_prefetch = 0 : i64, scratch_operands = 0 : i64, tpu.core_type = #tpu.core_type<tc>} {
    %c0 = arith.constant 0 : index
    %c0_0 = arith.constant 0 : index
    %c0_1 = arith.constant 0 : index
    %0 = vector.load %arg0[%c0, %c0_0, %c0_1] : memref<2x8x32xf32, #tpu.memory_space<vmem>>, vector<2x8x32xf32>
    %1 = vector.shape_cast %0 : vector<2x8x32xf32> to vector<16x32xf32>
    %c0_2 = arith.constant 0 : index
    %c0_3 = arith.constant 0 : index
    %2 = vector.load %arg1[%c0_2, %c0_3] : memref<32x96xf32, #tpu.memory_space<vmem>>, vector<32x96xf32>
    %cst = arith.constant dense<0.000000e+00> : vector<16x96xf32>
    %3 = tpu.matmul %1, %2, %cst {dimension_numbers = #tpu.dot_dimension_numbers<[1], [0], [0], [1], [0, 0, 1, 1], [], []>} : vector<16x32xf32>, vector<32x96xf32>, vector<16x96xf32> -> vector<16x96xf32>
    %c0_4 = arith.constant 0 : index
    %c0_5 = arith.constant 0 : index
    %4 = vector.load %arg2[%c0_4, %c0_5] : memref<1x96xf32, #tpu.memory_space<vmem>>, vector<1x96xf32>
    %5 = vector.broadcast %4 : vector<1x96xf32> to vector<16x96xf32>
    %6 = arith.addf %3, %5 : vector<16x96xf32>
    %7 = vector.shape_cast %6 : vector<16x96xf32> to vector<2x8x96xf32>
    %8 = vector.extract_strided_slice %7 {offsets = [0, 0, 0], sizes = [2, 8, 8], strides = [1, 1, 1]} : vector<2x8x96xf32> to vector<2x8x8xf32>
    %9 = vector.extract_strided_slice %7 {offsets = [0, 0, 32], sizes = [2, 8, 8], strides = [1, 1, 1]} : vector<2x8x96xf32> to vector<2x8x8xf32>
    %10 = vector.extract_strided_slice %7 {offsets = [0, 0, 64], sizes = [2, 8, 8], strides = [1, 1, 1]} : vector<2x8x96xf32> to vector<2x8x8xf32>
    "tpu.trace_start"() <{level = 10 : i32, message = "bqd,bkd->bqk"}> : () -> ()
    %cst_6 = arith.constant dense<0.000000e+00> : vector<2x8x8xf32>
    %11 = tpu.matmul %8, %9, %cst_6 {dimension_numbers = #tpu.dot_dimension_numbers<[2], [2], [1], [1], [0, 0, 0, 1, 1, 1], [0], [0]>} : vector<2x8x8xf32>, vector<2x8x8xf32>, vector<2x8x8xf32> -> vector<2x8x8xf32>
    "tpu.trace_stop"() : () -> ()
    %cst_7 = arith.constant 0.353553385 : f32
    %12 = vector.broadcast %cst_7 : f32 to vector<2x8x8xf32>
    %13 = arith.mulf %11, %12 : vector<2x8x8xf32>
    %cst_8 = arith.constant dense<0xFF800000> : vector<2x8xf32>
    %14 = vector.multi_reduction <maximumf>, %13, %cst_8 [2] : vector<2x8x8xf32> to vector<2x8xf32>
    %15 = vector.shape_cast %14 : vector<2x8xf32> to vector<2x8x1xf32>
    %16 = vector.broadcast %15 : vector<2x8x1xf32> to vector<2x8x8xf32>
    %17 = arith.subf %13, %16 : vector<2x8x8xf32>
    %18 = math.exp %17 : vector<2x8x8xf32>
    %cst_9 = arith.constant dense<0.000000e+00> : vector<2x8xf32>
    %19 = vector.multi_reduction <add>, %18, %cst_9 [2] : vector<2x8x8xf32> to vector<2x8xf32>
    %20 = vector.shape_cast %19 : vector<2x8xf32> to vector<2x8x1xf32>
    %21 = tpu.reciprocal %20 {approx = true} : vector<2x8x1xf32> -> vector<2x8x1xf32>
    %22 = vector.broadcast %21 : vector<2x8x1xf32> to vector<2x8x8xf32>
    %23 = arith.mulf %18, %22 : vector<2x8x8xf32>
    "tpu.trace_start"() <{level = 10 : i32, message = "bqk,bkd->bqd"}> : () -> ()
    %cst_10 = arith.constant dense<0.000000e+00> : vector<2x8x8xf32>
    %24 = tpu.matmul %23, %10, %cst_10 {dimension_numbers = #tpu.dot_dimension_numbers<[2], [1], [1], [2], [0, 0, 0, 1, 1, 2], [0], [0]>} : vector<2x8x8xf32>, vector<2x8x8xf32>, vector<2x8x8xf32> -> vector<2x8x8xf32>
    "tpu.trace_stop"() : () -> ()
    %25 = vector.extract_strided_slice %7 {offsets = [0, 0, 8], sizes = [2, 8, 8], strides = [1, 1, 1]} : vector<2x8x96xf32> to vector<2x8x8xf32>
    %26 = vector.extract_strided_slice %7 {offsets = [0, 0, 40], sizes = [2, 8, 8], strides = [1, 1, 1]} : vector<2x8x96xf32> to vector<2x8x8xf32>
    %27 = vector.extract_strided_slice %7 {offsets = [0, 0, 72], sizes = [2, 8, 8], strides = [1, 1, 1]} : vector<2x8x96xf32> to vector<2x8x8xf32>
    "tpu.trace_start"() <{level = 10 : i32, message = "bqd,bkd->bqk"}> : () -> ()
    %cst_11 = arith.constant dense<0.000000e+00> : vector<2x8x8xf32>
    %28 = tpu.matmul %25, %26, %cst_11 {dimension_numbers = #tpu.dot_dimension_numbers<[2], [2], [1], [1], [0, 0, 0, 1, 1, 1], [0], [0]>} : vector<2x8x8xf32>, vector<2x8x8xf32>, vector<2x8x8xf32> -> vector<2x8x8xf32>
    "tpu.trace_stop"() : () -> ()
    %cst_12 = arith.constant 0.353553385 : f32
    %29 = vector.broadcast %cst_12 : f32 to vector<2x8x8xf32>
    %30 = arith.mulf %28, %29 : vector<2x8x8xf32>
    %cst_13 = arith.constant dense<0xFF800000> : vector<2x8xf32>
    %31 = vector.multi_reduction <maximumf>, %30, %cst_13 [2] : vector<2x8x8xf32> to vector<2x8xf32>
    %32 = vector.shape_cast %31 : vector<2x8xf32> to vector<2x8x1xf32>
    %33 = vector.broadcast %32 : vector<2x8x1xf32> to vector<2x8x8xf32>
    %34 = arith.subf %30, %33 : vector<2x8x8xf32>
    %35 = math.exp %34 : vector<2x8x8xf32>
    %cst_14 = arith.constant dense<0.000000e+00> : vector<2x8xf32>
    %36 = vector.multi_reduction <add>, %35, %cst_14 [2] : vector<2x8x8xf32> to vector<2x8xf32>
    %37 = vector.shape_cast %36 : vector<2x8xf32> to vector<2x8x1xf32>
    %38 = tpu.reciprocal %37 {approx = true} : vector<2x8x1xf32> -> vector<2x8x1xf32>
    %39 = vector.broadcast %38 : vector<2x8x1xf32> to vector<2x8x8xf32>
    %40 = arith.mulf %35, %39 : vector<2x8x8xf32>
    "tpu.trace_start"() <{level = 10 : i32, message = "bqk,bkd->bqd"}> : () -> ()
    %cst_15 = arith.constant dense<0.000000e+00> : vector<2x8x8xf32>
    %41 = tpu.matmul %40, %27, %cst_15 {dimension_numbers = #tpu.dot_dimension_numbers<[2], [1], [1], [2], [0, 0, 0, 1, 1, 2], [0], [0]>} : vector<2x8x8xf32>, vector<2x8x8xf32>, vector<2x8x8xf32> -> vector<2x8x8xf32>
    "tpu.trace_stop"() : () -> ()
    %42 = vector.extract_strided_slice %7 {offsets = [0, 0, 16], sizes = [2, 8, 8], strides = [1, 1, 1]} : vector<2x8x96xf32> to vector<2x8x8xf32>
    %43 = vector.extract_strided_slice %7 {offsets = [0, 0, 48], sizes = [2, 8, 8], strides = [1, 1, 1]} : vector<2x8x96xf32> to vector<2x8x8xf32>
    %44 = vector.extract_strided_slice %7 {offsets = [0, 0, 80], sizes = [2, 8, 8], strides = [1, 1, 1]} : vector<2x8x96xf32> to vector<2x8x8xf32>
    "tpu.trace_start"() <{level = 10 : i32, message = "bqd,bkd->bqk"}> : () -> ()
    %cst_16 = arith.constant dense<0.000000e+00> : vector<2x8x8xf32>
    %45 = tpu.matmul %42, %43, %cst_16 {dimension_numbers = #tpu.dot_dimension_numbers<[2], [2], [1], [1], [0, 0, 0, 1, 1, 1], [0], [0]>} : vector<2x8x8xf32>, vector<2x8x8xf32>, vector<2x8x8xf32> -> vector<2x8x8xf32>
    "tpu.trace_stop"() : () -> ()
    %cst_17 = arith.constant 0.353553385 : f32
    %46 = vector.broadcast %cst_17 : f32 to vector<2x8x8xf32>
    %47 = arith.mulf %45, %46 : vector<2x8x8xf32>
    %cst_18 = arith.constant dense<0xFF800000> : vector<2x8xf32>
    %48 = vector.multi_reduction <maximumf>, %47, %cst_18 [2] : vector<2x8x8xf32> to vector<2x8xf32>
    %49 = vector.shape_cast %48 : vector<2x8xf32> to vector<2x8x1xf32>
    %50 = vector.broadcast %49 : vector<2x8x1xf32> to vector<2x8x8xf32>
    %51 = arith.subf %47, %50 : vector<2x8x8xf32>
    %52 = math.exp %51 : vector<2x8x8xf32>
    %cst_19 = arith.constant dense<0.000000e+00> : vector<2x8xf32>
    %53 = vector.multi_reduction <add>, %52, %cst_19 [2] : vector<2x8x8xf32> to vector<2x8xf32>
    %54 = vector.shape_cast %53 : vector<2x8xf32> to vector<2x8x1xf32>
    %55 = tpu.reciprocal %54 {approx = true} : vector<2x8x1xf32> -> vector<2x8x1xf32>
    %56 = vector.broadcast %55 : vector<2x8x1xf32> to vector<2x8x8xf32>
    %57 = arith.mulf %52, %56 : vector<2x8x8xf32>
    "tpu.trace_start"() <{level = 10 : i32, message = "bqk,bkd->bqd"}> : () -> ()
    %cst_20 = arith.constant dense<0.000000e+00> : vector<2x8x8xf32>
    %58 = tpu.matmul %57, %44, %cst_20 {dimension_numbers = #tpu.dot_dimension_numbers<[2], [1], [1], [2], [0, 0, 0, 1, 1, 2], [0], [0]>} : vector<2x8x8xf32>, vector<2x8x8xf32>, vector<2x8x8xf32> -> vector<2x8x8xf32>
    "tpu.trace_stop"() : () -> ()
    %59 = vector.extract_strided_slice %7 {offsets = [0, 0, 24], sizes = [2, 8, 8], strides = [1, 1, 1]} : vector<2x8x96xf32> to vector<2x8x8xf32>
    %60 = vector.extract_strided_slice %7 {offsets = [0, 0, 56], sizes = [2, 8, 8], strides = [1, 1, 1]} : vector<2x8x96xf32> to vector<2x8x8xf32>
    %61 = vector.extract_strided_slice %7 {offsets = [0, 0, 88], sizes = [2, 8, 8], strides = [1, 1, 1]} : vector<2x8x96xf32> to vector<2x8x8xf32>
    "tpu.trace_start"() <{level = 10 : i32, message = "bqd,bkd->bqk"}> : () -> ()
    %cst_21 = arith.constant dense<0.000000e+00> : vector<2x8x8xf32>
    %62 = tpu.matmul %59, %60, %cst_21 {dimension_numbers = #tpu.dot_dimension_numbers<[2], [2], [1], [1], [0, 0, 0, 1, 1, 1], [0], [0]>} : vector<2x8x8xf32>, vector<2x8x8xf32>, vector<2x8x8xf32> -> vector<2x8x8xf32>
    "tpu.trace_stop"() : () -> ()
    %cst_22 = arith.constant 0.353553385 : f32
    %63 = vector.broadcast %cst_22 : f32 to vector<2x8x8xf32>
    %64 = arith.mulf %62, %63 : vector<2x8x8xf32>
    %cst_23 = arith.constant dense<0xFF800000> : vector<2x8xf32>
    %65 = vector.multi_reduction <maximumf>, %64, %cst_23 [2] : vector<2x8x8xf32> to vector<2x8xf32>
    %66 = vector.shape_cast %65 : vector<2x8xf32> to vector<2x8x1xf32>
    %67 = vector.broadcast %66 : vector<2x8x1xf32> to vector<2x8x8xf32>
    %68 = arith.subf %64, %67 : vector<2x8x8xf32>
    %69 = math.exp %68 : vector<2x8x8xf32>
    %cst_24 = arith.constant dense<0.000000e+00> : vector<2x8xf32>
    %70 = vector.multi_reduction <add>, %69, %cst_24 [2] : vector<2x8x8xf32> to vector<2x8xf32>
    %71 = vector.shape_cast %70 : vector<2x8xf32> to vector<2x8x1xf32>
    %72 = tpu.reciprocal %71 {approx = true} : vector<2x8x1xf32> -> vector<2x8x1xf32>
    %73 = vector.broadcast %72 : vector<2x8x1xf32> to vector<2x8x8xf32>
    %74 = arith.mulf %69, %73 : vector<2x8x8xf32>
    "tpu.trace_start"() <{level = 10 : i32, message = "bqk,bkd->bqd"}> : () -> ()
    %cst_25 = arith.constant dense<0.000000e+00> : vector<2x8x8xf32>
    %75 = tpu.matmul %74, %61, %cst_25 {dimension_numbers = #tpu.dot_dimension_numbers<[2], [1], [1], [2], [0, 0, 0, 1, 1, 2], [0], [0]>} : vector<2x8x8xf32>, vector<2x8x8xf32>, vector<2x8x8xf32> -> vector<2x8x8xf32>
    "tpu.trace_stop"() : () -> ()
    %76 = tpu.concatenate %24, %41, %58, %75 in 2 : vector<2x8x8xf32>, vector<2x8x8xf32>, vector<2x8x8xf32>, vector<2x8x8xf32> -> vector<2x8x32xf32>
    %c0_26 = arith.constant 0 : index
    %c0_27 = arith.constant 0 : index
    %c0_28 = arith.constant 0 : index
    %77 = vector.load %arg3[%c0_26, %c0_27, %c0_28] : memref<2x8x32xf32, #tpu.memory_space<vmem>>, vector<2x8x32xf32>
    tpu.vector_store %arg3[%c0_26, %c0_27, %c0_28], %76 {strides = array<i32>} : memref<2x8x32xf32, #tpu.memory_space<vmem>>, vector<2x8x32xf32>,
    return
  }
}

</mosaic_0001>

<bundles_post_ra>
// kernel: tpu_custom_call.1
= control target key start
LH: loop header
LB: loop body
LE: loop exit
PB: predicated region body
PF: predicated region fallthrough
CT: control target
= control target key end

     0   :  { %8 = vsyncpa [#allocation3], 0  ;;  %s1988_s0 = inlined_call_operand.hbm [shape: f32[2,8,32], index: 0, kind: input, shape index: {}]   ;;  %s1989_s1 = inlined_call_operand.hbm [shape: f32[32,96], index: 1, kind: input, shape index: {}]   ;;  %s1990_s2 = inlined_call_operand.vmem [shape: f32[1,96], index: 2, kind: input, shape index: {}]   ;;  %s1991_s3 = inlined_call_operand.hbm [shape: f32[2,8,32], index: 3, kind: output, shape index: {}]  }
   0x1   :  { %9 = vsyncpa [#allocation6], 0 }
   0x2   :  { %10 = vsyncpa [#allocation4], 0  ;;  %s1791_s12 = smov [#allocation2]  }
   0x3   :  { %s16_s13 = sshll.u32 %s1791_s12, 4  ;;  %s17_s13 = int_to_ptr.vmem [resolvable:$true] %s16_s13 }
   0x4   :  { %s1733_s14 = scalar_lea.vmem %s17_s13, 256  ;;  %p1738_p1 = scmp.lt.s32.totalorder %s17_s13, %s17_s13 }
   0x5   :  { %p1734_p0 = scmp.ne.s32.totalorder %s17_s13, %s1733_s14  ;;  %p1739_p2 = scmp.lt.s32.totalorder %s1733_s14, %s1733_s14 }
   0x7   :  { %p1740_p3 = por %p1739_p2, %p1738_p1 }
   0x9   :  { %p1741_p4 = pnand %p1740_p3, %p1734_p0 }
   0xb   :  { %1744 = shalt.err (!%p1741_p4)
}
   0xc   :  { %s1792_s15 = smov 128   ;;  %s1793_s16 = smov 8  }
   0xd   :  { %22 = dma.hbm_to_vmem [thread:$0]  %s1988_s0, 256, %s17_s13, [#allocation3], %s1792_s15, %s1792_s15, %s1793_s16  }
   0xe   :  { %s1794_s19 = smov [#allocation5]  }
   0xf   :  { %s28_s20 = sshll.u32 %s1794_s19, 4  ;;  %s29_s20 = int_to_ptr.vmem [resolvable:$true] %s28_s20 }
  0x10   :  { %s1753_s21 = scalar_lea.vmem %s29_s20, 512  ;;  %p1758_p6 = scmp.lt.s32.totalorder %s29_s20, %s29_s20 }
  0x11   :  { %p1754_p5 = scmp.ne.s32.totalorder %s29_s20, %s1753_s21  ;;  %p1759_p7 = scmp.lt.s32.totalorder %s1753_s21, %s1753_s21 }
  0x13   :  { %p1760_p8 = por %p1759_p7, %p1758_p6 }
  0x15   :  { %p1761_p9 = pnand %p1760_p8, %p1754_p5 }
  0x17   :  { %1764 = shalt.err (!%p1761_p9)
}
  0x18   :  { %34 = dma.hbm_to_vmem [thread:$0]  %s1989_s1, 512, %s29_s20, [#allocation6], %s1792_s15, %s1792_s15, %s1793_s16  }
  0x19   :  { %1785 = dma.done.wait [#allocation3], 256  }
  0x1a   :  { %1786 = vsyncadd [#allocation3], 4294967040 }
  0x1b   :  { %1787 = dma.done.wait [#allocation6], 512  }
  0x1c   :  { %1788 = vsyncadd [#allocation6], 4294966784  ;;  %vm56_vm0 = vcmask 261120   ;;  %v48_v0 = vld [vmem:[#allocation5 + $0x18] sm:$0xff]  ;;  %v47_v1 = vld [vmem:[#allocation5 + $0x10] sm:$0xff]  ;;  %v1795_v6 = vmov 0.0  }
  0x1d   :  { %1582 = vmatprep.subr.mxu0 %v48_v0  ;;  %v43_v2 = vld [vmem:[#allocation2] sm:$0xff]  ;;  %v46_v3 = vld [vmem:[#allocation5 + $0x8] sm:$0xff]  ;;  %v45_v4 = vld [vmem:[#allocation5] sm:$0xff]  ;;  %1593 = vmatprep.subr.mxu1 %v1795_v6  ;;  %vm1796_vm1 = vmmov 0   ;;  %s1797_s24 = smov 96   ;;  %vm141_vm2 = vcmask 64512  }
  0x1e   :  { %1583 = vmatpush3.msra.mxu0 %v48_v0  ;;  %1590 = vmatprep.mubr.msk.f32.mxu0 %vm56_vm0, %v43_v2  ;;  %v44_v5 = vld [vmem:[#allocation2 + $0x8] sm:$0xff]  ;;  %v1517_v8 = vld [vmem:[%s1990_s2] ss:$0 sm:$0xff]  ;;  %s1798_s2 = smov 64   ;;  %s1799_s25 = smov 88   ;;  %vm1494_vm3 = vcmask 195584  }
  0x1f   :  { %1584 = vmatprep.subr.mxu0 %v47_v1  ;;  %1595 = vmatprep.mubr.msk.f32.mxu1 %vm1796_vm1, %v1795_v6  ;;  %s1800_s26 = smov 120   ;;  %s1801_s27 = smov 56   ;;  %vm1491_vm4 = vcmask 130048  }
  0x20   :  { %1585 = vmatpush3.msra.mxu0 %v47_v1  ;;  %s1802_s28 = smov 80   ;;  %s1803_s29 = smov 112  }
  0x21   :  { %1586 = vmatprep.subr.mxu0 %v46_v3  ;;  %s1804_s30 = smov 48   ;;  %s1805_s4 = smov 72  }
  0x22   :  { %1587 = vmatpush3.msra.mxu0 %v46_v3  ;;  %s1806_s5 = smov 104   ;;  %s1807_s6 = smov 40  }
  0x23   :  { %1588 = vmatprep.subr.mxu0 %v45_v4  ;;  %s1808_s7 = smov 16   ;;  %s1809_s8 = smov 24  }
  0x24   :  { %1589 = vmatpush3.msra.mxu0 %v45_v4  ;;  %s1810_s9 = smov [#allocation7]  }
  0x25   :  { %1591 = vmatmul.mubr.msk.f32.vlgmr.msra.gmra.mxu0 %vm56_vm0, %v44_v5  ;;  %1603 = vmatprep.subr.mxu0 %v1795_v6  ;;  %s1504_s10 = sshll.u32 %s1810_s9, 4  ;;  %s1505_s10 = int_to_ptr.vmem [resolvable:$true] %s1504_s10 }
  0x26   :  { %1605 = vmatprep.mubr.msk.f32.mxu0 %vm1796_vm1, %v1795_v6  ;;  %s1765_s11 = scalar_lea.vmem %s1505_s10, 256  ;;  %p1770_p11 = scmp.lt.s32.totalorder %s1505_s10, %s1505_s10 }
  0x27   :  { %p1766_p10 = scmp.ne.s32.totalorder %s1505_s10, %s1765_s11  ;;  %p1771_p12 = scmp.lt.s32.totalorder %s1765_s11, %s1765_s11 }
  0x29   :  { %p1772_p13 = por %p1771_p12, %p1770_p11 }
  0x2b   :  { %p1773_p0 = pnand %p1772_p13, %p1766_p10 }
  0xe5   :  { %v1592_v7 = vpop.f32.mrf.mxu0 }
  0xe6   :  { %v1857_v11 = vadd.f32 %v1592_v7, %v1517_v8 }
  0xe7   :  { %v129_v9 = vpop.f32.mrf.mxu0 }
  0xe8   :  { %v1854_v10 = vadd.f32 %v1517_v8, %v129_v9 }
  0xea   :  { %139 = vrot.lane.b32.xlu0 %v1854_v10, %s1797_s24 }
  0xee   :  { %217 = vrot.lane.b32.xlu0 %v1857_v11, %s1797_s24 }
 0x15c   :  { %v140_v12 = vpop.permute.xlu0 %139 }
 0x15d   :  { %1594 = vmatpush3.xpose.msk.msra.mxu1 %vm141_vm2, %v140_v12 }
 0x15e   :  { %1598 = vmatprep.subr.mxu1 %v1795_v6 }
 0x160   :  { %1596 = vmatmul.mubr.msk.f32.vlgmr.msra.gmra.mxu1 %vm141_vm2, %v1854_v10  ;;  %v218_v13 = vpop.permute.xlu0 %217 }
 0x161   :  { %1599 = vmatpush3.xpose.msk.msra.mxu1 %vm141_vm2, %v218_v13  ;;  %1600 = vmatprep.mubr.msk.f32.mxu1 %vm1796_vm1, %v1795_v6 }
 0x162   :  { %1608 = vmatprep.subr.mxu1 %v1795_v6 }
 0x164   :  { %1601 = vmatmul.mubr.msk.f32.vlgmr.msra.gmra.mxu1 %vm141_vm2, %v1857_v11 }
 0x165   :  { %1610 = vmatprep.mubr.msk.f32.mxu1 %vm1796_vm1, %v1795_v6 }
 0x220   :  { %v212_v14 = vpop.f32.mrf.mxu1 }
 0x221   :  { %v293_v15 = vmul.f32 0.35355338, %v212_v14 }
 0x222   :  { %v1597_v16 = vpop.f32.mrf.mxu1 }
 0x223   :  { %v295_v17 = vsel %vm141_vm2, %v293_v15, -inf }
 0x224   :  { %296 = vmax.xlane.f32.xlu1 %v295_v17  ;;  %v289_v18 = vpop.f32.mrf.mxu1 }
 0x225   :  { %v294_v19 = vmul.f32 0.35355338, %v289_v18 }
 0x226   :  { %v1602_v20 = vpop.f32.mrf.mxu1 }
 0x227   :  { %v298_v21 = vsel %vm141_vm2, %v294_v19, -inf }
 0x228   :  { %299 = vmax.xlane.f32.xlu1 %v298_v21 }
 0x239   :  { %317 = vrot.lane.b32.xlu1 %v1854_v10, %s1798_s2 }
 0x23d   :  { %393 = vrot.lane.b32.xlu1 %v1857_v11, %s1798_s2 }
 0x241   :  { %471 = vrot.lane.b32.xlu1 %v1854_v10, %s1799_s25 }
 0x245   :  { %549 = vrot.lane.b32.xlu1 %v1857_v11, %s1799_s25 }
 0x2ad   :  { %v297_v22 = vpop.xlane.xlu1 %296 }
 0x2ae   :  { %v301_v23 = vsub.f32 %v293_v15, %v297_v22 }
 0x2b0   :  { %v303_v24 = vmul.f32 1.442695, %v301_v23 }
 0x2b1   :  { %v300_v25 = vpop.xlane.xlu1 %299 }
 0x2b2   :  { %1693 = vpow2.f32 %v303_v24  ;;  %v302_v26 = vsub.f32 %v294_v19, %v300_v25 }
 0x2b4   :  { %v305_v27 = vmul.f32 1.442695, %v302_v26 }
 0x2b5   :  { %v318_v28 = vpop.permute.xlu1 %317 }
 0x2b6   :  { %1695 = vpow2.f32 %v305_v27  ;;  %1604 = vmatpush3.msra.mxu0 %v318_v28 }
 0x2b7   :  { %1613 = vmatprep.subr.mxu0 %v1795_v6 }
 0x2b9   :  { %v394_v29 = vpop.permute.xlu1 %393 }
 0x2ba   :  { %1609 = vmatpush3.msra.mxu1 %v394_v29 }
 0x2bb   :  { %1618 = vmatprep.subr.mxu1 %v1795_v6 }
 0x2bd   :  { %v472_v34 = vpop.permute.xlu1 %471 }
 0x2bf   :  { %v1694_v30 = vpop.eup %1693 }
 0x2c0   :  { %v307_v31 = vsel %vm141_vm2, %v1694_v30, 0.0 }
 0x2c1   :  { %308 = vadd.xlane.f32.xlu0 %v307_v31  ;;  %v550_v35 = vpop.permute.xlu1 %549 }
 0x2c3   :  { %v1696_v32 = vpop.eup %1695 }
 0x2c4   :  { %v310_v33 = vsel %vm141_vm2, %v1696_v32, 0.0 }
 0x2c5   :  { %311 = vadd.xlane.f32.xlu1 %v310_v33 }
 0x2d6   :  { %547 = vrot.lane.b32.xlu1 %v1857_v11, %s1800_s26 }
 0x2d7   :  { %469 = vrot.lane.b32.xlu0 %v1854_v10, %s1800_s26 }
 0x34a   :  { %v309_v36 = vpop.xlane.xlu0 %308 }
 0x34b   :  { %1697 = vrcp.f32 %v309_v36 }
 0x34e   :  { %v312_v37 = vpop.xlane.xlu1 %311  ;;  %v470_v42 = vpop.permute.xlu0 %469 }
 0x34f   :  { %1699 = vrcp.f32 %v312_v37 }
 0x352   :  { %v548_v43 = vpop.permute.xlu1 %547 }
 0x358   :  { %v1698_v38 = vpop.eup %1697 }
 0x359   :  { %v315_v39 = vmul.f32 %v1698_v38, %v1694_v30 }
 0x35b   :  { %1606 = vmatmul.mubr.msk.f32.vlgmr.msra.gmra.mxu0 %vm141_vm2, %v315_v39 }
 0x35c   :  { %v1700_v40 = vpop.eup %1699  ;;  %1614 = vmatpush3.xpose.msk.msra.mxu0 %vm141_vm2, %v472_v34  ;;  %1615 = vmatprep.mubr.msk.f32.mxu0 %vm1796_vm1, %v1795_v6 }
 0x35d   :  { %v316_v41 = vmul.f32 %v1700_v40, %v1696_v32  ;;  %1623 = vmatprep.subr.mxu0 %v1795_v6 }
 0x35f   :  { %1611 = vmatmul.mubr.msk.f32.vlgmr.msra.gmra.mxu1 %vm141_vm2, %v316_v41  ;;  %1616 = vmatmul.mubr.msk.f32.vlgmr.msra.gmra.mxu0 %vm141_vm2, %v470_v42 }
 0x360   :  { %1619 = vmatpush3.xpose.msk.msra.mxu1 %vm141_vm2, %v550_v35  ;;  %1620 = vmatprep.mubr.msk.f32.mxu1 %vm1796_vm1, %v1795_v6 }
 0x361   :  { %1628 = vmatprep.subr.mxu1 %v1795_v6  ;;  %1625 = vmatprep.mubr.msk.f32.mxu0 %vm1796_vm1, %v1795_v6 }
 0x363   :  { %1621 = vmatmul.mubr.msk.f32.vlgmr.msra.gmra.mxu1 %vm141_vm2, %v548_v43 }
 0x364   :  { %1630 = vmatprep.mubr.msk.f32.mxu1 %vm1796_vm1, %v1795_v6 }
 0x41b   :  { %v1900_v44 = vpop.f32.mrf.mxu0 }
 0x41d   :  { %v1607_v45 = vpop.f32.mrf.mxu0 }
 0x41f   :  { %v1902_v46 = vpop.f32.mrf.mxu1  ;;  %v543_v47 = vpop.f32.mrf.mxu0 }
 0x420   :  { %v625_v48 = vmul.f32 0.35355338, %v543_v47 }
 0x421   :  { %v1612_v49 = vpop.f32.mrf.mxu1  ;;  %v1617_v50 = vpop.f32.mrf.mxu0 }
 0x422   :  { %v627_v51 = vsel %vm141_vm2, %v625_v48, -inf }
 0x423   :  { %v621_v52 = vpop.f32.mrf.mxu1  ;;  %628 = vmax.xlane.f32.xlu1 %v627_v51 }
 0x424   :  { %v626_v53 = vmul.f32 0.35355338, %v621_v52 }
 0x425   :  { %v1622_v54 = vpop.f32.mrf.mxu1 }
 0x426   :  { %v630_v55 = vsel %vm141_vm2, %v626_v53, -inf }
 0x427   :  { %631 = vmax.xlane.f32.xlu0 %v630_v55 }
 0x434   :  { %649 = vrot.lane.b32.xlu1 %v1854_v10, %s1801_s27 }
 0x438   :  { %803 = vrot.lane.b32.xlu1 %v1854_v10, %s1802_s28 }
 0x43c   :  { %881 = vrot.lane.b32.xlu1 %v1857_v11, %s1802_s28 }
 0x43d   :  { %725 = vrot.lane.b32.xlu0 %v1857_v11, %s1801_s27 }
 0x441   :  { %801 = vrot.lane.b32.xlu0 %v1854_v10, %s1803_s29 }
 0x4ac   :  { %v629_v56 = vpop.xlane.xlu1 %628 }
 0x4ad   :  { %v633_v57 = vsub.f32 %v625_v48, %v629_v56 }
 0x4af   :  { %v635_v58 = vmul.f32 1.442695, %v633_v57 }
 0x4b0   :  { %v650_v59 = vpop.permute.xlu1 %649  ;;  %v632_v60 = vpop.xlane.xlu0 %631 }
 0x4b1   :  { %1701 = vpow2.f32 %v635_v58  ;;  %v634_v61 = vsub.f32 %v626_v53, %v632_v60  ;;  %1624 = vmatpush3.msra.mxu0 %v650_v59 }
 0x4b2   :  { %1633 = vmatprep.subr.mxu0 %v1795_v6 }
 0x4b3   :  { %v637_v62 = vmul.f32 1.442695, %v634_v61 }
 0x4b4   :  { %v726_v63 = vpop.permute.xlu0 %725  ;;  %v804_v4 = vpop.permute.xlu1 %803 }
 0x4b5   :  { %1703 = vpow2.f32 %v637_v62  ;;  %1629 = vmatpush3.msra.mxu1 %v726_v63 }
 0x4b6   :  { %1638 = vmatprep.subr.mxu1 %v1795_v6 }
 0x4b8   :  { %v882_v5 = vpop.permute.xlu1 %881  ;;  %v802_v15 = vpop.permute.xlu0 %801 }
 0x4be   :  { %v1702_v0 = vpop.eup %1701 }
 0x4bf   :  { %v639_v1 = vsel %vm141_vm2, %v1702_v0, 0.0 }
 0x4c0   :  { %640 = vadd.xlane.f32.xlu1 %v639_v1 }
 0x4c2   :  { %v1704_v2 = vpop.eup %1703 }
 0x4c3   :  { %v642_v3 = vsel %vm141_vm2, %v1704_v2, 0.0 }
 0x4c4   :  { %643 = vadd.xlane.f32.xlu1 %v642_v3 }
 0x4d5   :  { %879 = vrot.lane.b32.xlu1 %v1857_v11, %s1803_s29 }
 0x549   :  { %v641_v7 = vpop.xlane.xlu1 %640 }
 0x54a   :  { %1705 = vrcp.f32 %v641_v7 }
 0x54d   :  { %v644_v8 = vpop.xlane.xlu1 %643 }
 0x54e   :  { %1707 = vrcp.f32 %v644_v8 }
 0x551   :  { %v880_v16 = vpop.permute.xlu1 %879 }
 0x557   :  { %v1706_v9 = vpop.eup %1705 }
 0x558   :  { %v647_v12 = vmul.f32 %v1706_v9, %v1702_v0 }
 0x55a   :  { %1626 = vmatmul.mubr.msk.f32.vlgmr.msra.gmra.mxu0 %vm141_vm2, %v647_v12 }
 0x55b   :  { %v1708_v13 = vpop.eup %1707  ;;  %1634 = vmatpush3.xpose.msk.msra.mxu0 %vm141_vm2, %v804_v4  ;;  %1635 = vmatprep.mubr.msk.f32.mxu0 %vm1796_vm1, %v1795_v6 }
 0x55c   :  { %v648_v14 = vmul.f32 %v1708_v13, %v1704_v2  ;;  %1643 = vmatprep.subr.mxu0 %v1795_v6 }
 0x55e   :  { %1631 = vmatmul.mubr.msk.f32.vlgmr.msra.gmra.mxu1 %vm141_vm2, %v648_v14  ;;  %1636 = vmatmul.mubr.msk.f32.vlgmr.msra.gmra.mxu0 %vm141_vm2, %v802_v15 }
 0x55f   :  { %1639 = vmatpush3.xpose.msk.msra.mxu1 %vm141_vm2, %v882_v5  ;;  %1640 = vmatprep.mubr.msk.f32.mxu1 %vm1796_vm1, %v1795_v6 }
 0x560   :  { %1648 = vmatprep.subr.mxu1 %v1795_v6  ;;  %1645 = vmatprep.mubr.msk.f32.mxu0 %vm1796_vm1, %v1795_v6 }
 0x562   :  { %1641 = vmatmul.mubr.msk.f32.vlgmr.msra.gmra.mxu1 %vm141_vm2, %v880_v16 }
 0x563   :  { %1650 = vmatprep.mubr.msk.f32.mxu1 %vm1796_vm1, %v1795_v6 }
 0x61a   :  { %v1932_v17 = vpop.f32.mrf.mxu0 }
 0x61c   :  { %v1627_v18 = vpop.f32.mrf.mxu0 }
 0x61e   :  { %v1934_v19 = vpop.f32.mrf.mxu1  ;;  %v875_v20 = vpop.f32.mrf.mxu0 }
 0x61f   :  { %v957_v21 = vmul.f32 0.35355338, %v875_v20 }
 0x620   :  { %v1632_v22 = vpop.f32.mrf.mxu1  ;;  %v1637_v23 = vpop.f32.mrf.mxu0 }
 0x621   :  { %v959_v24 = vsel %vm141_vm2, %v957_v21, -inf }
 0x622   :  { %v953_v25 = vpop.f32.mrf.mxu1  ;;  %960 = vmax.xlane.f32.xlu0 %v959_v24 }
 0x623   :  { %v958_v26 = vmul.f32 0.35355338, %v953_v25 }
 0x624   :  { %v1642_v27 = vpop.f32.mrf.mxu1 }
 0x625   :  { %v962_v28 = vsel %vm141_vm2, %v958_v26, -inf }
 0x626   :  { %963 = vmax.xlane.f32.xlu1 %v962_v28 }
 0x637   :  { %981 = vrot.lane.b32.xlu1 %v1854_v10, %s1804_s30 }
 0x63b   :  { %1135 = vrot.lane.b32.xlu1 %v1854_v10, %s1805_s4 }
 0x63f   :  { %1213 = vrot.lane.b32.xlu1 %v1857_v11, %s1805_s4 }
 0x643   :  { %1211 = vrot.lane.b32.xlu1 %v1857_v11, %s1806_s5 }
 0x6ab   :  { %v961_v29 = vpop.xlane.xlu0 %960 }
 0x6ac   :  { %v965_v30 = vsub.f32 %v957_v21, %v961_v29 }
 0x6ae   :  { %v967_v31 = vmul.f32 1.442695, %v965_v30 }
 0x6af   :  { %v964_v32 = vpop.xlane.xlu1 %963 }
 0x6b0   :  { %1709 = vpow2.f32 %v967_v31  ;;  %v966_v33 = vsub.f32 %v958_v26, %v964_v32 }
 0x6b2   :  { %v969_v34 = vmul.f32 1.442695, %v966_v33 }
 0x6b3   :  { %v982_v35 = vpop.permute.xlu1 %981 }
 0x6b4   :  { %1711 = vpow2.f32 %v969_v34  ;;  %1644 = vmatpush3.msra.mxu0 %v982_v35 }
 0x6b5   :  { %1653 = vmatprep.subr.mxu0 %v1795_v6 }
 0x6b7   :  { %v1136_v43 = vpop.permute.xlu1 %1135 }
 0x6bb   :  { %v1214_v49 = vpop.permute.xlu1 %1213 }
 0x6bd   :  { %v1710_v36 = vpop.eup %1709 }
 0x6be   :  { %v971_v37 = vsel %vm141_vm2, %v1710_v36, 0.0 }
 0x6bf   :  { %972 = vadd.xlane.f32.xlu0 %v971_v37  ;;  %v1212_v52 = vpop.permute.xlu1 %1211 }
 0x6c1   :  { %v1712_v38 = vpop.eup %1711 }
 0x6c2   :  { %v974_v39 = vsel %vm141_vm2, %v1712_v38, 0.0 }
 0x6c3   :  { %975 = vadd.xlane.f32.xlu0 %v974_v39 }
 0x6d9   :  { %1057 = vrot.lane.b32.xlu0 %v1857_v11, %s1804_s30 }
 0x6dd   :  { %1133 = vrot.lane.b32.xlu0 %v1854_v10, %s1806_s5 }
 0x748   :  { %v973_v40 = vpop.xlane.xlu0 %972 }
 0x749   :  { %1713 = vrcp.f32 %v973_v40 }
 0x74c   :  { %v976_v41 = vpop.xlane.xlu0 %975 }
 0x74d   :  { %1715 = vrcp.f32 %v976_v41 }
 0x750   :  { %v1058_v42 = vpop.permute.xlu0 %1057 }
 0x751   :  { %1649 = vmatpush3.msra.mxu1 %v1058_v42 }
 0x752   :  { %1658 = vmatprep.subr.mxu1 %v1795_v6 }
 0x754   :  { %v1134_v51 = vpop.permute.xlu0 %1133 }
 0x756   :  { %v1714_v45 = vpop.eup %1713 }
 0x757   :  { %v979_v47 = vmul.f32 %v1714_v45, %v1710_v36 }
 0x759   :  { %1646 = vmatmul.mubr.msk.f32.vlgmr.msra.gmra.mxu0 %vm141_vm2, %v979_v47 }
 0x75a   :  { %v1716_v48 = vpop.eup %1715  ;;  %1654 = vmatpush3.xpose.msk.msra.mxu0 %vm141_vm2, %v1136_v43  ;;  %1655 = vmatprep.mubr.msk.f32.mxu0 %vm1796_vm1, %v1795_v6 }
 0x75b   :  { %v980_v50 = vmul.f32 %v1716_v48, %v1712_v38  ;;  %1663 = vmatprep.subr.mxu0 %v1795_v6 }
 0x75d   :  { %1651 = vmatmul.mubr.msk.f32.vlgmr.msra.gmra.mxu1 %vm141_vm2, %v980_v50  ;;  %1656 = vmatmul.mubr.msk.f32.vlgmr.msra.gmra.mxu0 %vm141_vm2, %v1134_v51 }
 0x75e   :  { %1659 = vmatpush3.xpose.msk.msra.mxu1 %vm141_vm2, %v1214_v49  ;;  %1660 = vmatprep.mubr.msk.f32.mxu1 %vm1796_vm1, %v1795_v6 }
 0x75f   :  { %1668 = vmatprep.subr.mxu1 %v1795_v6  ;;  %1665 = vmatprep.mubr.msk.f32.mxu0 %vm1796_vm1, %v1795_v6 }
 0x761   :  { %1661 = vmatmul.mubr.msk.f32.vlgmr.msra.gmra.mxu1 %vm141_vm2, %v1212_v52 }
 0x762   :  { %1670 = vmatprep.mubr.msk.f32.mxu1 %vm1796_vm1, %v1795_v6 }
 0x819   :  { %v1053_v53 = vpop.f32.mrf.mxu0 }
 0x81b   :  { %v1647_v54 = vpop.f32.mrf.mxu0 }
 0x81d   :  { %v1129_v55 = vpop.f32.mrf.mxu1  ;;  %v1207_v56 = vpop.f32.mrf.mxu0 }
 0x81e   :  { %v1289_v57 = vmul.f32 0.35355338, %v1207_v56 }
 0x81f   :  { %v1652_v58 = vpop.f32.mrf.mxu1  ;;  %v1657_v59 = vpop.f32.mrf.mxu0 }
 0x820   :  { %v1291_v60 = vsel %vm141_vm2, %v1289_v57, -inf }
 0x821   :  { %v1285_v61 = vpop.f32.mrf.mxu1  ;;  %1292 = vmax.xlane.f32.xlu0 %v1291_v60 }
 0x822   :  { %v1290_v62 = vmul.f32 0.35355338, %v1285_v61 }
 0x823   :  { %v1662_v63 = vpop.f32.mrf.mxu1 }
 0x824   :  { %v1294_v0 = vsel %vm141_vm2, %v1290_v62, -inf }
 0x825   :  { %1295 = vmax.xlane.f32.xlu1 %v1294_v0 }
 0x836   :  { %1313 = vrot.lane.b32.xlu1 %v1854_v10, %s1807_s6 }
 0x83a   :  { %1467 = vrot.lane.b32.xlu1 %v1932_v17, %s1793_s16 }
 0x83e   :  { %1469 = vrot.lane.b32.xlu1 %v1934_v19, %s1793_s16 }
 0x842   :  { %1477 = vrot.lane.b32.xlu1 %v1129_v55, %s1808_s7 }
 0x8aa   :  { %v1293_v6 = vpop.xlane.xlu0 %1292 }
 0x8ab   :  { %v1297_v1 = vsub.f32 %v1289_v57, %v1293_v6 }
 0x8ad   :  { %v1299_v2 = vmul.f32 1.442695, %v1297_v1 }
 0x8ae   :  { %v1296_v3 = vpop.xlane.xlu1 %1295 }
 0x8af   :  { %1717 = vpow2.f32 %v1299_v2  ;;  %v1298_v4 = vsub.f32 %v1290_v62, %v1296_v3 }
 0x8b1   :  { %v1301_v5 = vmul.f32 1.442695, %v1298_v4 }
 0x8b2   :  { %v1314_v7 = vpop.permute.xlu1 %1313 }
 0x8b3   :  { %1719 = vpow2.f32 %v1301_v5  ;;  %1664 = vmatpush3.msra.mxu0 %v1314_v7 }
 0x8b6   :  { %v1468_v23 = vpop.permute.xlu1 %1467 }
 0x8b7   :  { %v1489_v26 = vsel %vm141_vm2, %v1900_v44, %v1468_v23 }
 0x8ba   :  { %v1470_v24 = vpop.permute.xlu1 %1469 }
 0x8bb   :  { %v1490_v31 = vsel %vm141_vm2, %v1902_v46, %v1470_v24 }
 0x8bc   :  { %v1718_v8 = vpop.eup %1717 }
 0x8bd   :  { %v1303_v10 = vsel %vm141_vm2, %v1718_v8, 0.0 }
 0x8be   :  { %1304 = vadd.xlane.f32.xlu0 %v1303_v10  ;;  %v1478_v27 = vpop.permute.xlu1 %1477 }
 0x8bf   :  { %v1493_v32 = vsel %vm1491_vm4, %v1490_v31, %v1478_v27 }
 0x8c0   :  { %v1720_v9 = vpop.eup %1719 }
 0x8c1   :  { %v1306_v12 = vsel %vm141_vm2, %v1720_v9, 0.0 }
 0x8c2   :  { %1307 = vadd.xlane.f32.xlu0 %v1306_v12 }
 0x8d8   :  { %1389 = vrot.lane.b32.xlu0 %v1857_v11, %s1807_s6 }
 0x8dc   :  { %1475 = vrot.lane.b32.xlu0 %v1053_v53, %s1808_s7 }
 0x947   :  { %v1305_v13 = vpop.xlane.xlu0 %1304 }
 0x948   :  { %1721 = vrcp.f32 %v1305_v13 }
 0x94b   :  { %v1308_v14 = vpop.xlane.xlu0 %1307 }
 0x94c   :  { %1723 = vrcp.f32 %v1308_v14 }
 0x94f   :  { %v1390_v15 = vpop.permute.xlu0 %1389 }
 0x950   :  { %1669 = vmatpush3.msra.mxu1 %v1390_v15 }
 0x953   :  { %v1476_v25 = vpop.permute.xlu0 %1475 }
 0x954   :  { %v1492_v28 = vsel %vm1491_vm4, %v1489_v26, %v1476_v25 }
 0x955   :  { %v1722_v16 = vpop.eup %1721 }
 0x956   :  { %v1311_v17 = vmul.f32 %v1722_v16, %v1718_v8 }
 0x958   :  { %1666 = vmatmul.mubr.msk.f32.vlgmr.msra.gmra.mxu0 %vm141_vm2, %v1311_v17 }
 0x959   :  { %v1724_v18 = vpop.eup %1723 }
 0x95a   :  { %v1312_v19 = vmul.f32 %v1724_v18, %v1720_v9 }
 0x95c   :  { %1671 = vmatmul.mubr.msk.f32.vlgmr.msra.gmra.mxu1 %vm141_vm2, %v1312_v19 }
 0xa18   :  { %v1385_v20 = vpop.f32.mrf.mxu0 }
 0xa19   :  { %1483 = vrot.lane.b32.xlu0 %v1385_v20, %s1809_s8 }
 0xa1a   :  { %v1667_v21 = vpop.f32.mrf.mxu0 }
 0xa1c   :  { %v1461_v11 = vpop.f32.mrf.mxu1 }
 0xa1d   :  { %1485 = vrot.lane.b32.xlu1 %v1461_v11, %s1809_s8 }
 0xa1e   :  { %v1672_v22 = vpop.f32.mrf.mxu1 }
 0xa8b   :  { %v1484_v29 = vpop.permute.xlu0 %1483 }
 0xa8c   :  { %v1495_v30 = vsel %vm1494_vm3, %v1492_v28, %v1484_v29 }
 0xa8d   :  { %1497 = vst.msk [vmem:[#allocation7] sm:$0xff] %vm56_vm0, %v1495_v30 }
 0xa8f   :  { %v1486_v33 = vpop.permute.xlu1 %1485 }
 0xa90   :  { %v1496_v34 = vsel %vm1494_vm3, %v1493_v32, %v1486_v33 }
 0xa91   :  { %1498 = vst.msk [vmem:[#allocation7 + $0x8] sm:$0xff] %vm56_vm0, %v1496_v34 }
 0xa92   :  { %1776 = shalt.err (!%p1773_p0)
}
 0xa93   :  { %1510 = dma.vmem_to_hbm [thread:$0]  %s1505_s10, 256, %s1991_s3, [#allocation4], %s1792_s15, %s1792_s15, %s1793_s16  }
 0xa94   :  { %1789 = dma.done.wait [#allocation4], 256  }
 0xa95   :  { %1790 = vsyncadd [#allocation4], 4294967040 }
 0xa96   :  { %1514 = vsyncpa [#allocation3], 1 }
 0xa97   :  { %1515 = vsyncpa [#allocation6], 1 }
 0xa98   :  { %1516 = vsyncpa [#allocation4], 1 }

</bundles_post_ra>
